<compile_context>
chip_gen: v5e
topology: v5e:2x2
jax: 0.10.0
libtpu: 0.0.40
codegen_flags: <defaults>
</compile_context>

<pallas_src>
import functools

import jax
import jax.numpy as jnp
from jax.experimental import pallas as pl
from jax.experimental.pallas import tpu as pltpu


def _round_up(x, m):
    return (x + m - 1) // m * m


def dueling_dqn_kernel(x_ref, we_ref, be_ref, wh_ref, bh_ref, q_ref, h_acc):
    """Grid = (batch tiles [parallel], F chunks [arbitrary, reduction])."""
    k = pl.program_id(1)

    @pl.when(k == 0)
    def _init():
        h_acc[...] = jnp.zeros_like(h_acc)

    # Encoder partial matmul: accumulate x_chunk @ W_enc_chunk in f32.
    # x arrives as f32 straight from HBM; cast to bf16 on-core (free VPU work)
    # so the MXU runs at native bf16 rate.
    h_acc[...] += jnp.dot(x_ref[...].astype(jnp.bfloat16), we_ref[...],
                          preferred_element_type=jnp.float32)

    @pl.when(k == pl.num_programs(1) - 1)
    def _finalize_tile():
        # Encoder bias + ReLU, then one fused MXU pass over the 128-wide head
        # slab: columns [0:ACT] = w_a + w_v  (so the MXU emits a+v directly),
        # column ACT = pure value head, remaining columns zero.
        h = jnp.maximum(h_acc[...] + be_ref[...], 0.0)
        q_ref[...] = jnp.dot(h.astype(jnp.bfloat16), wh_ref[...],
                             preferred_element_type=jnp.float32) + bh_ref[...]


def prepare_params(w_enc, b_enc, w_v, b_v, w_a, b_a):
    """One-time weight prep (hoisted out of the forward path): pad to lane
    widths, fold the V head into every A column, cast to bf16."""
    F, HID = w_enc.shape
    ACT = w_a.shape[1]
    assert ACT <= 127, "value column is packed at lane index ACT of a 128-wide slab"
    HID_pad = _round_up(HID, 128)
    HEAD_W = 128

    we_p = (jnp.zeros((F, HID_pad), jnp.float32)
            .at[:, :HID].set(w_enc)).astype(jnp.bfloat16)
    be_p = jnp.zeros((1, HID_pad), jnp.float32).at[:, :HID].set(
        b_enc.reshape(1, HID))

    wh = jnp.zeros((HID_pad, HEAD_W), jnp.float32)
    wh = wh.at[:HID, :ACT].set(w_a + w_v)        # (HID,1) value head broadcast
    wh = wh.at[:HID, ACT].set(w_v[:, 0])         # pure value head for mean(a)
    wh_p = wh.astype(jnp.bfloat16)

    b_v0 = b_v.reshape(-1)[0]
    bh_p = (jnp.zeros((1, HEAD_W), jnp.float32)
            .at[0, :ACT].set(b_a.reshape(-1) + b_v0)
            .at[0, ACT].set(b_v0))
    return we_p, be_p, wh_p, bh_p


@functools.partial(jax.jit, static_argnames=(
    "action_size", "tm_max", "tk_max", "vmem_budget_bytes"))
def dueling_dqn_forward(x_nchw, we_p, be_p, wh_p, bh_p, *, action_size,
                        tm_max=256, tk_max=2048,
                        vmem_budget_bytes=48 << 20):
    """x_nchw: (B, C, H, W) float32.  Returns Q of shape (B, action_size)."""
    B = x_nchw.shape[0]
    x_flat = x_nchw.reshape(B, -1).astype(jnp.float32)   # torch x.reshape(B,-1)
    F = x_flat.shape[1]
    F_w, HID_pad = we_p.shape
    assert F == F_w, "encoder weight does not match flattened input size"
    HEAD_W = wh_p.shape[1]
    ACT = action_size

    # Batch tile: 16-aligned, capped by tm_max (256 aligns with the MXU rows).
    tm = max(16, min(_round_up(tm_max, 16), _round_up(B, 16)))
    B_pad = _round_up(B, tm)
    nb = B_pad // tm

    # VMEM footprint for a candidate feature chunk tk (double-buffered specs).
    def footprint(tk_):
        return (2 * tm * tk_ * 4            # x tile (f32, pipelined)
                + 2 * tk_ * HID_pad * 2     # w_enc chunk (bf16)
                + 2 * HID_pad * 4           # b_enc
                + 2 * HID_pad * HEAD_W * 2  # fused head weights (bf16)
                + 2 * HEAD_W * 4            # fused head bias
                + 2 * tm * HEAD_W * 4       # q tile
                + tm * HID_pad * 4)         # h accumulator scratch

    # K(F)-axis tiling: largest 128-multiple divisor of F under the budget.
    if F % 128 == 0:
        cap = max(128, min(_round_up(tk_max, 128), F))
        cap -= cap % 128
        tk = 128
        for cand in range(cap, 0, -128):
            if F % cand == 0 and footprint(cand) <= vmem_budget_bytes:
                tk = cand
                break
    else:
        tk = F        # single K step; block spans the full (non-aligned) dim
    nk = max(1, F // tk) if F % tk == 0 else 1
    if nk == 1:
        tk = F

    fp = footprint(tk)
    assert fp <= vmem_budget_bytes, (
        f"VMEM footprint {fp} exceeds budget {vmem_budget_bytes}; "
        "reduce tm_max / tk_max")
    vmem_limit = max(fp + (4 << 20), 16 << 20)   # explicit limit + headroom

    # Pad only the batch dim (cheap); F is streamed unpadded.
    if B_pad != B:
        x_flat = jnp.pad(x_flat, ((0, B_pad - B), (0, 0)))

    q_pad = pl.pallas_call(
        dueling_dqn_kernel,
        out_shape=jax.ShapeDtypeStruct((B_pad, HEAD_W), jnp.float32),
        grid_spec=pltpu.PrefetchScalarGridSpec(
            num_scalar_prefetch=0,
            grid=(nb, nk),
            in_specs=[
                pl.BlockSpec((tm, tk), lambda i, k: (i, k)),        # x chunk
                pl.BlockSpec((tk, HID_pad), lambda i, k: (k, 0)),   # w_enc chunk
                pl.BlockSpec((1, HID_pad), lambda i, k: (0, 0)),    # b_enc
                pl.BlockSpec((HID_pad, HEAD_W), lambda i, k: (0, 0)),  # fused head W
                pl.BlockSpec((1, HEAD_W), lambda i, k: (0, 0)),     # fused head b
            ],
            # Per-batch-tile pipelined output (lane-dense 128-wide slab),
            # resident only across the inner K axis.
            out_specs=pl.BlockSpec((tm, HEAD_W), lambda i, k: (i, 0)),
            scratch_shapes=[pltpu.VMEM((tm, HID_pad), jnp.float32)],
        ),
        compiler_params=pltpu.CompilerParams(
            # Batch tiles are independent -> parallel (v7x dual-TC);
            # K axis is a reduction -> arbitrary.
            dimension_semantics=("parallel", "arbitrary"),
            vmem_limit_bytes=int(vmem_limit),
        ),
    )(x_flat, we_p, be_p, wh_p, bh_p)

    # torch semantics: Q = v + a - mean(a)  with a GLOBAL mean over batch and
    # actions.  Columns [0:ACT] already hold a+v; column ACT holds pure v, so
    # mean(a) = mean(a+v) - mean(v).  One tiny elementwise/reduce in XLA.
    q_valid = q_pad[:B]
    av = q_valid[:, :ACT]
    mean_a = jnp.mean(av) - jnp.mean(q_valid[:, ACT])
    return av - mean_a


def reference_forward(x_nchw, w_enc, b_enc, w_v, b_v, w_a, b_a):
    """Pure-JAX reference (unfused heads) with matching bf16/f32 precision."""
    B = x_nchw.shape[0]
    x = x_nchw.reshape(B, -1).astype(jnp.bfloat16)
    h = jnp.maximum(
        jnp.dot(x, w_enc.astype(jnp.bfloat16),
                preferred_element_type=jnp.float32) + b_enc.reshape(1, -1), 0.0)
    hb = h.astype(jnp.bfloat16)
    v = jnp.dot(hb, w_v.astype(jnp.bfloat16),
                preferred_element_type=jnp.float32) + b_v.reshape(1, -1)
    a = jnp.dot(hb, w_a.astype(jnp.bfloat16),
                preferred_element_type=jnp.float32) + b_a.reshape(1, -1)
    return v + a - jnp.mean(a)   # torch.mean(a): global mean over batch & actions


if __name__ == "__main__":
    # Small deterministic problem: batch=2, channels=4, spatial=16x16,
    # encoder hidden=32, action_size=8.
    B, C, H, W = 2, 4, 16, 16
    F = C * H * W          # 1024
    HID = 32
    ACT = 8

    key = jax.random.PRNGKey(0)
    k_x, k_we, k_be, k_wv, k_bv, k_wa, k_ba, k_x2 = jax.random.split(key, 8)

    x = jax.random.normal(k_x, (B, C, H, W), dtype=jnp.float32)

    # Deterministic parameter init (stand-in for nn.Linear's init).
    w_enc = jax.random.normal(k_we, (F, HID), dtype=jnp.float32) * 0.02
    b_enc = jax.random.normal(k_be, (1, HID), dtype=jnp.float32) * 0.01
    w_v   = jax.random.normal(k_wv, (HID, 1), dtype=jnp.float32) * 0.1
    b_v   = jax.random.normal(k_bv, (1, 1),   dtype=jnp.float32) * 0.01
    w_a   = jax.random.normal(k_wa, (HID, ACT), dtype=jnp.float32) * 0.1
    b_a   = jax.random.normal(k_ba, (1, ACT),  dtype=jnp.float32) * 0.01

    # Hoisted, one-time weight prep (padded bf16 slabs, fused/folded heads).
    we_p, be_p, wh_p, bh_p = prepare_params(w_enc, b_enc, w_v, b_v, w_a, b_a)

    # Single-tile case (B=2 -> one batch tile, one K step).
    q = dueling_dqn_forward(x, we_p, be_p, wh_p, bh_p, action_size=ACT)
    q = jax.block_until_ready(q)
    q_ref = reference_forward(x, w_enc, b_enc, w_v, b_v, w_a, b_a)
    assert q.shape == (B, ACT), q.shape
    assert jnp.allclose(q, q_ref, atol=5e-3, rtol=5e-3), "mismatch vs reference (B=2)"

    # Multi-tile case: B=20 with tm=16 -> 2 batch tiles (parallel axis), and
    # tk_max=512 -> 2 feature chunks (K accumulation + gated finalize).
    B2 = 20
    x2 = jax.random.normal(k_x2, (B2, C, H, W), dtype=jnp.float32)
    q2 = dueling_dqn_forward(x2, we_p, be_p, wh_p, bh_p, action_size=ACT,
                             tm_max=16, tk_max=512)
    q2 = jax.block_until_ready(q2)
    q2_ref = reference_forward(x2, w_enc, b_enc, w_v, b_v, w_a, b_a)
    assert q2.shape == (B2, ACT), q2.shape
    assert jnp.allclose(q2, q2_ref, atol=5e-3, rtol=5e-3), "mismatch vs reference (B=20)"

    print("KERNEL_OK")
</pallas_src>

<mosaic_0001>
module attributes {stable_mosaic.version = 11 : i64} {
  func.func @dueling_dqn_kernel(%arg0: i32, %arg1: i32, %arg2: memref<16x1024xf32, #tpu.memory_space<vmem>>, %arg3: memref<1024x128xbf16, #tpu.memory_space<vmem>>, %arg4: memref<1x128xf32, #tpu.memory_space<vmem>>, %arg5: memref<128x128xbf16, #tpu.memory_space<vmem>>, %arg6: memref<1x128xf32, #tpu.memory_space<vmem>>, %arg7: memref<16x128xf32, #tpu.memory_space<vmem>>, %arg8: memref<16x128xf32, #tpu.memory_space<vmem>>) attributes {dimension_semantics = [#tpu.dimension_semantics<parallel>, #tpu.dimension_semantics<arbitrary>], iteration_bounds = array<i64: 1, 1>, scalar_prefetch = 0 : i64, scratch_operands = 1 : i64, tpu.core_type = #tpu.core_type<tc>, window_params = [{transform_indices = @transform_0, window_bounds = array<i64: 16, 1024>}, {transform_indices = @transform_1, window_bounds = array<i64: 1024, 128>}, {pipeline_mode = #tpu.pipeline_mode<synchronous>, transform_indices = @transform_2, window_bounds = array<i64: 1, 128>}, {pipeline_mode = #tpu.pipeline_mode<synchronous>, transform_indices = @transform_3, window_bounds = array<i64: 128, 128>}, {pipeline_mode = #tpu.pipeline_mode<synchronous>, transform_indices = @transform_4, window_bounds = array<i64: 1, 128>}, {transform_indices = @transform_5, window_bounds = array<i64: 16, 128>}]} {
    %c0_i32 = arith.constant 0 : i32
    %0 = arith.cmpi eq, %arg1, %c0_i32 : i32
    %1 = arith.extui %0 : i1 to i32
    %c0_i32_0 = arith.constant 0 : i32
    %2 = arith.cmpi ne, %1, %c0_i32_0 : i32
    scf.if %2 {
      %cst_10 = arith.constant 0.000000e+00 : f32
      %13 = vector.broadcast %cst_10 : f32 to vector<16x128xf32>
      %c0_11 = arith.constant 0 : index
      %c0_12 = arith.constant 0 : index
      %14 = vector.load %arg8[%c0_11, %c0_12] : memref<16x128xf32, #tpu.memory_space<vmem>>, vector<16x128xf32>
      tpu.vector_store %arg8[%c0_11, %c0_12], %13 {strides = array<i32>} : memref<16x128xf32, #tpu.memory_space<vmem>>, vector<16x128xf32>,
    } else {
    }
    %c0 = arith.constant 0 : index
    %c0_1 = arith.constant 0 : index
    %3 = vector.load %arg8[%c0, %c0_1] : memref<16x128xf32, #tpu.memory_space<vmem>>, vector<16x128xf32>
    %c0_2 = arith.constant 0 : index
    %c0_3 = arith.constant 0 : index
    %4 = vector.load %arg2[%c0_2, %c0_3] : memref<16x1024xf32, #tpu.memory_space<vmem>>, vector<16x1024xf32>
    %5 = arith.truncf %4 : vector<16x1024xf32> to vector<16x1024xbf16>
    %c0_4 = arith.constant 0 : index
    %c0_5 = arith.constant 0 : index
    %6 = vector.load %arg3[%c0_4, %c0_5] : memref<1024x128xbf16, #tpu.memory_space<vmem>>, vector<1024x128xbf16>
    %cst = arith.constant dense<0.000000e+00> : vector<16x128xf32>
    %7 = tpu.matmul %5, %6, %cst {dimension_numbers = #tpu.dot_dimension_numbers<[1], [0], [0], [1], [0, 0, 1, 1], [], []>} : vector<16x1024xbf16>, vector<1024x128xbf16>, vector<16x128xf32> -> vector<16x128xf32>
    %8 = arith.addf %3, %7 : vector<16x128xf32>
    %c0_6 = arith.constant 0 : index
    %c0_7 = arith.constant 0 : index
    %9 = vector.load %arg8[%c0_6, %c0_7] : memref<16x128xf32, #tpu.memory_space<vmem>>, vector<16x128xf32>
    tpu.vector_store %arg8[%c0_6, %c0_7], %8 {strides = array<i32>} : memref<16x128xf32, #tpu.memory_space<vmem>>, vector<16x128xf32>,
    %c0_i32_8 = arith.constant 0 : i32
    %10 = arith.cmpi eq, %arg1, %c0_i32_8 : i32
    %11 = arith.extui %10 : i1 to i32
    %c0_i32_9 = arith.constant 0 : i32
    %12 = arith.cmpi ne, %11, %c0_i32_9 : i32
    scf.if %12 {
      %c0_10 = arith.constant 0 : index
      %c0_11 = arith.constant 0 : index
      %13 = vector.load %arg8[%c0_10, %c0_11] : memref<16x128xf32, #tpu.memory_space<vmem>>, vector<16x128xf32>
      %c0_12 = arith.constant 0 : index
      %c0_13 = arith.constant 0 : index
      %14 = vector.load %arg4[%c0_12, %c0_13] : memref<1x128xf32, #tpu.memory_space<vmem>>, vector<1x128xf32>
      %15 = vector.broadcast %14 : vector<1x128xf32> to vector<16x128xf32>
      %16 = arith.addf %13, %15 : vector<16x128xf32>
      %cst_14 = arith.constant 0.000000e+00 : f32
      %17 = vector.broadcast %cst_14 : f32 to vector<16x128xf32>
      %18 = arith.maximumf %16, %17 : vector<16x128xf32>
      %19 = arith.truncf %18 : vector<16x128xf32> to vector<16x128xbf16>
      %c0_15 = arith.constant 0 : index
      %c0_16 = arith.constant 0 : index
      %20 = vector.load %arg5[%c0_15, %c0_16] : memref<128x128xbf16, #tpu.memory_space<vmem>>, vector<128x128xbf16>
      %cst_17 = arith.constant dense<0.000000e+00> : vector<16x128xf32>
      %21 = tpu.matmul %19, %20, %cst_17 {dimension_numbers = #tpu.dot_dimension_numbers<[1], [0], [0], [1], [0, 0, 1, 1], [], []>} : vector<16x128xbf16>, vector<128x128xbf16>, vector<16x128xf32> -> vector<16x128xf32>
      %c0_18 = arith.constant 0 : index
      %c0_19 = arith.constant 0 : index
      %22 = vector.load %arg6[%c0_18, %c0_19] : memref<1x128xf32, #tpu.memory_space<vmem>>, vector<1x128xf32>
      %23 = vector.broadcast %22 : vector<1x128xf32> to vector<16x128xf32>
      %24 = arith.addf %21, %23 : vector<16x128xf32>
      %c0_20 = arith.constant 0 : index
      %c0_21 = arith.constant 0 : index
      %25 = vector.load %arg7[%c0_20, %c0_21] : memref<16x128xf32, #tpu.memory_space<vmem>>, vector<16x128xf32>
      tpu.vector_store %arg7[%c0_20, %c0_21], %24 {strides = array<i32>} : memref<16x128xf32, #tpu.memory_space<vmem>>, vector<16x128xf32>,
    } else {
    }
    return
  }
  func.func @transform_0(%arg0: i32, %arg1: i32) -> (i32, i32) {
    %c0_i32 = arith.constant 0 : i32
    return %arg0, %arg1 : i32, i32
  }
  func.func @transform_1(%arg0: i32, %arg1: i32) -> (i32, i32) {
    %c0_i32 = arith.constant 0 : i32
    %c0_i32_0 = arith.constant 0 : i32
    return %arg1, %c0_i32 : i32, i32
  }
  func.func @transform_2(%arg0: i32, %arg1: i32) -> (i32, i32) {
    %c0_i32 = arith.constant 0 : i32
    %c0_i32_0 = arith.constant 0 : i32
    %c0_i32_1 = arith.constant 0 : i32
    return %c0_i32, %c0_i32_0 : i32, i32
  }
  func.func @transform_3(%arg0: i32, %arg1: i32) -> (i32, i32) {
    %c0_i32 = arith.constant 0 : i32
    %c0_i32_0 = arith.constant 0 : i32
    %c0_i32_1 = arith.constant 0 : i32
    return %c0_i32, %c0_i32_0 : i32, i32
  }
  func.func @transform_4(%arg0: i32, %arg1: i32) -> (i32, i32) {
    %c0_i32 = arith.constant 0 : i32
    %c0_i32_0 = arith.constant 0 : i32
    %c0_i32_1 = arith.constant 0 : i32
    return %c0_i32, %c0_i32_0 : i32, i32
  }
  func.func @transform_5(%arg0: i32, %arg1: i32) -> (i32, i32) {
    %c0_i32 = arith.constant 0 : i32
    %c0_i32_0 = arith.constant 0 : i32
    return %arg0, %c0_i32 : i32, i32
  }
}

</mosaic_0001>

<bundles_post_ra>
// kernel: dueling_dqn_forward.1
= control target key start
LH: loop header
LB: loop body
LE: loop exit
PB: predicated region body
PF: predicated region fallthrough
CT: control target
= control target key end

     0   :  { %10 = vsyncpa [#allocation4], 0  ;;  %s1190_s21 = smov [#allocation3]   ;;  %s1191_s23 = smov 64   ;;  %s1310_s0 = inlined_call_operand.vmem [shape: f32[16,1024], index: 0, kind: input, shape index: {}]   ;;  %s1311_s1 = inlined_call_operand.hbm [shape: bf16[1024,128], index: 1, kind: input, shape index: {}]   ;;  %s1312_s2 = inlined_call_operand.vmem [shape: f32[1,128], index: 2, kind: input, shape index: {}]   ;;  %s1313_s3 = inlined_call_operand.vmem [shape: bf16[128,128], index: 3, kind: input, shape index: {}]   ;;  %s1314_s4 = inlined_call_operand.vmem [shape: f32[1,128], index: 4, kind: input, shape index: {}]   ;;  %s1315_s5 = inlined_call_operand.vmem [shape: f32[16,128], index: 5, kind: output, shape index: {}]  }
   0x1   :  { %s17_s20 = sshll.u32 %s1311_s1, 4  ;;  %s19_s22 = sshll.u32 %s1190_s21, 4  ;;  %s18_s20 = int_to_ptr.hbm [resolvable:$true] %s17_s20  ;;  %s20_s22 = int_to_ptr.vmem [resolvable:$true] %s19_s22 }
   0x2   :  { %s1192_s24 = smov 4  }
   0x3   :  { %25 = dma.hbm_to_vmem [thread:$0]  %s18_s20, 8192, %s20_s22, [#allocation4], %s1191_s23, %s1191_s23, %s1192_s24  }
   0x4   :  { %1188 = dma.done.wait [#allocation4], 8192  }
   0x5   :  { %1189 = vsyncadd [#allocation4], 4294959104  ;;  %v1094_v0 = vld [vmem:[#allocation3 + $0x38] sm:$0xff]  ;;  %v1093_v4 = vld [vmem:[#allocation3 + $0x30] sm:$0xff] }
   0x6   :  { %v1102_v1 = vld [vmem:[#allocation3 + $0x78] sm:$0xff]  ;;  %580 = vmatpush.bf16.msra.mxu0 %v1094_v0  ;;  %v1101_v5 = vld [vmem:[#allocation3 + $0x70] sm:$0xff]  ;;  %v1092_v8 = vld [vmem:[#allocation3 + $0x28] sm:$0xff] }
   0x7   :  { %v1110_v2 = vld [vmem:[#allocation3 + $0xb8] sm:$0xff]  ;;  %594 = vmatpush.bf16.msra.mxu1 %v1102_v1  ;;  %v1109_v6 = vld [vmem:[#allocation3 + $0xb0] sm:$0xff]  ;;  %v1100_v9 = vld [vmem:[#allocation3 + $0x68] sm:$0xff] }
   0x8   :  { %v1118_v3 = vld [vmem:[#allocation3 + $0xf8] sm:$0xff]  ;;  %608 = vmatpush.bf16.msra.mxu2 %v1110_v2  ;;  %v1117_v7 = vld [vmem:[#allocation3 + $0xf0] sm:$0xff]  ;;  %v1108_v10 = vld [vmem:[#allocation3 + $0xa8] sm:$0xff] }
   0x9   :  { %622 = vmatpush.bf16.msra.mxu3 %v1118_v3  ;;  %v1116_v11 = vld [vmem:[#allocation3 + $0xe8] sm:$0xff]  ;;  %v1091_v12 = vld [vmem:[#allocation3 + $0x20] sm:$0xff]  ;;  %v1090_v16 = vld [vmem:[#allocation3 + $0x18] sm:$0xff] }
   0xa   :  { %581 = vmatpush.bf16.msra.mxu0 %v1093_v4  ;;  %v1099_v13 = vld [vmem:[#allocation3 + $0x60] sm:$0xff]  ;;  %v1098_v17 = vld [vmem:[#allocation3 + $0x58] sm:$0xff]  ;;  %v1089_v20 = vld [vmem:[#allocation3 + $0x10] sm:$0xff] }
   0xb   :  { %595 = vmatpush.bf16.msra.mxu1 %v1101_v5  ;;  %v1107_v14 = vld [vmem:[#allocation3 + $0xa0] sm:$0xff]  ;;  %v1106_v18 = vld [vmem:[#allocation3 + $0x98] sm:$0xff]  ;;  %v1097_v21 = vld [vmem:[#allocation3 + $0x50] sm:$0xff] }
   0xc   :  { %609 = vmatpush.bf16.msra.mxu2 %v1109_v6  ;;  %v1115_v15 = vld [vmem:[#allocation3 + $0xe0] sm:$0xff]  ;;  %v1114_v19 = vld [vmem:[#allocation3 + $0xd8] sm:$0xff]  ;;  %v1105_v22 = vld [vmem:[#allocation3 + $0x90] sm:$0xff] }
   0xd   :  { %623 = vmatpush.bf16.msra.mxu3 %v1117_v7  ;;  %v1113_v23 = vld [vmem:[#allocation3 + $0xd0] sm:$0xff]  ;;  %v1088_v24 = vld [vmem:[#allocation3 + $0x8] sm:$0xff]  ;;  %v1087_v28 = vld [vmem:[#allocation3] sm:$0xff] }
   0xe   :  { %582 = vmatpush.bf16.msra.mxu0 %v1092_v8  ;;  %v1096_v25 = vld [vmem:[#allocation3 + $0x48] sm:$0xff]  ;;  %v1095_v29 = vld [vmem:[#allocation3 + $0x40] sm:$0xff]  ;;  %v1126_v32 = vld [vmem:[#allocation3 + $0x138] sm:$0xff] }
   0xf   :  { %596 = vmatpush.bf16.msra.mxu1 %v1100_v9  ;;  %v1104_v26 = vld [vmem:[#allocation3 + $0x88] sm:$0xff]  ;;  %v1103_v30 = vld [vmem:[#allocation3 + $0x80] sm:$0xff]  ;;  %v1134_v33 = vld [vmem:[#allocation3 + $0x178] sm:$0xff] }
  0x10   :  { %610 = vmatpush.bf16.msra.mxu2 %v1108_v10  ;;  %v1112_v27 = vld [vmem:[#allocation3 + $0xc8] sm:$0xff]  ;;  %v1111_v31 = vld [vmem:[#allocation3 + $0xc0] sm:$0xff]  ;;  %v46_v34 = vld [vmem:[%s1310_s0 + $0x10] sm:$0xff] }
  0x11   :  { %624 = vmatpush.bf16.msra.mxu3 %v1116_v11  ;;  %v54_v35 = vld [vmem:[%s1310_s0 + $0x50] sm:$0xff]  ;;  %v47_v36 = vld [vmem:[%s1310_s0 + $0x18] sm:$0xff]  ;;  %v44_v38 = vld [vmem:[%s1310_s0] sm:$0xff] }
  0x12   :  { %583 = vmatpush.bf16.msra.mxu0 %v1091_v12  ;;  %v55_v37 = vld [vmem:[%s1310_s0 + $0x58] sm:$0xff]  ;;  %v52_v39 = vld [vmem:[%s1310_s0 + $0x40] sm:$0xff]  ;;  %v45_v40 = vld [vmem:[%s1310_s0 + $0x8] sm:$0xff]  ;;  %v62_v44 = vpack.c.bf16 %v54_v35, %v46_v34 }
  0x13   :  { %597 = vmatpush.bf16.msra.mxu1 %v1099_v13  ;;  %v53_v41 = vld [vmem:[%s1310_s0 + $0x48] sm:$0xff]  ;;  %v1142_v42 = vld [vmem:[#allocation3 + $0x1b8] sm:$0xff]  ;;  %v63_v45 = vpack.c.bf16 %v55_v37, %v47_v36  ;;  %v60_v46 = vpack.c.bf16 %v52_v39, %v44_v38  ;;  %v1125_v48 = vld [vmem:[#allocation3 + $0x130] sm:$0xff] }
  0x14   :  { %611 = vmatpush.bf16.msra.mxu2 %v1107_v14  ;;  %v1150_v43 = vld [vmem:[#allocation3 + $0x1f8] sm:$0xff]  ;;  %v61_v47 = vpack.c.bf16 %v53_v41, %v45_v40  ;;  %v1133_v49 = vld [vmem:[#allocation3 + $0x170] sm:$0xff]  ;;  %v1124_v52 = vld [vmem:[#allocation3 + $0x128] sm:$0xff] }
  0x15   :  { %625 = vmatpush.bf16.msra.mxu3 %v1115_v15  ;;  %v1141_v50 = vld [vmem:[#allocation3 + $0x1b0] sm:$0xff]  ;;  %v1132_v53 = vld [vmem:[#allocation3 + $0x168] sm:$0xff]  ;;  %v1123_v56 = vld [vmem:[#allocation3 + $0x120] sm:$0xff] }
  0x16   :  { %584 = vmatpush.bf16.msra.mxu0 %v1090_v16  ;;  %v1149_v51 = vld [vmem:[#allocation3 + $0x1f0] sm:$0xff]  ;;  %v1140_v54 = vld [vmem:[#allocation3 + $0x1a8] sm:$0xff]  ;;  %v1131_v57 = vld [vmem:[#allocation3 + $0x160] sm:$0xff] }
  0x17   :  { %598 = vmatpush.bf16.msra.mxu1 %v1098_v17  ;;  %v1148_v55 = vld [vmem:[#allocation3 + $0x1e8] sm:$0xff]  ;;  %v1139_v58 = vld [vmem:[#allocation3 + $0x1a0] sm:$0xff]  ;;  %v1122_v60 = vld [vmem:[#allocation3 + $0x118] sm:$0xff] }
  0x18   :  { %612 = vmatpush.bf16.msra.mxu2 %v1106_v18  ;;  %v1147_v59 = vld [vmem:[#allocation3 + $0x1e0] sm:$0xff]  ;;  %v1130_v61 = vld [vmem:[#allocation3 + $0x158] sm:$0xff]  ;;  %v1121_v0 = vld [vmem:[#allocation3 + $0x110] sm:$0xff] }
  0x19   :  { %626 = vmatpush.bf16.msra.mxu3 %v1114_v19  ;;  %v1138_v62 = vld [vmem:[#allocation3 + $0x198] sm:$0xff]  ;;  %v1129_v1 = vld [vmem:[#allocation3 + $0x150] sm:$0xff]  ;;  %v1120_v4 = vld [vmem:[#allocation3 + $0x108] sm:$0xff] }
  0x1a   :  { %585 = vmatpush.bf16.msra.mxu0 %v1089_v20  ;;  %v1146_v63 = vld [vmem:[#allocation3 + $0x1d8] sm:$0xff]  ;;  %v1137_v2 = vld [vmem:[#allocation3 + $0x190] sm:$0xff]  ;;  %v1128_v5 = vld [vmem:[#allocation3 + $0x148] sm:$0xff] }
  0x1b   :  { %599 = vmatpush.bf16.msra.mxu1 %v1097_v21  ;;  %v1145_v3 = vld [vmem:[#allocation3 + $0x1d0] sm:$0xff]  ;;  %v1136_v6 = vld [vmem:[#allocation3 + $0x188] sm:$0xff]  ;;  %v1119_v8 = vld [vmem:[#allocation3 + $0x100] sm:$0xff] }
  0x1c   :  { %613 = vmatpush.bf16.msra.mxu2 %v1105_v22  ;;  %v1144_v7 = vld [vmem:[#allocation3 + $0x1c8] sm:$0xff]  ;;  %v1127_v9 = vld [vmem:[#allocation3 + $0x140] sm:$0xff]  ;;  %v50_v16 = vld [vmem:[%s1310_s0 + $0x30] sm:$0xff] }
  0x1d   :  { %627 = vmatpush.bf16.msra.mxu3 %v1113_v23  ;;  %v1135_v10 = vld [vmem:[#allocation3 + $0x180] sm:$0xff]  ;;  %v49_v14 = vld [vmem:[%s1310_s0 + $0x28] sm:$0xff]  ;;  %v58_v17 = vld [vmem:[%s1310_s0 + $0x70] sm:$0xff] }
  0x1e   :  { %586 = vmatpush.bf16.msra.mxu0 %v1088_v24  ;;  %v1143_v11 = vld [vmem:[#allocation3 + $0x1c0] sm:$0xff]  ;;  %v57_v15 = vld [vmem:[%s1310_s0 + $0x68] sm:$0xff]  ;;  %v51_v18 = vld [vmem:[%s1310_s0 + $0x38] sm:$0xff]  ;;  %v66_v22 = vpack.c.bf16 %v58_v17, %v50_v16 }
  0x1f   :  { %600 = vmatpush.bf16.msra.mxu1 %v1096_v25  ;;  %v48_v12 = vld [vmem:[%s1310_s0 + $0x20] sm:$0xff]  ;;  %v59_v19 = vld [vmem:[%s1310_s0 + $0x78] sm:$0xff]  ;;  %v65_v21 = vpack.c.bf16 %v57_v15, %v49_v14  ;;  %v1157_v25 = vld [vmem:[%s1313_s3 + $0x30] sm:$0xff] }
  0x20   :  { %614 = vmatpush.bf16.msra.mxu2 %v1104_v26  ;;  %v56_v13 = vld [vmem:[%s1310_s0 + $0x60] sm:$0xff]  ;;  %v67_v23 = vpack.c.bf16 %v59_v19, %v51_v18  ;;  %v1158_v24 = vld [vmem:[%s1313_s3 + $0x38] sm:$0xff]  ;;  %v1156_v26 = vld [vmem:[%s1313_s3 + $0x28] sm:$0xff] }
  0x21   :  { %628 = vmatpush.bf16.msra.mxu3 %v1112_v27  ;;  %v64_v20 = vpack.c.bf16 %v56_v13, %v48_v12  ;;  %v1155_v27 = vld [vmem:[%s1313_s3 + $0x20] sm:$0xff] }
  0x22   :  { %587 = vmatpush.bf16.msra.mxu0 %v1087_v28  ;;  %v1154_v28 = vld [vmem:[%s1313_s3 + $0x18] sm:$0xff]  ;;  %v1151_v35 = vld [vmem:[%s1313_s3] sm:$0xff] }
  0x23   :  { %601 = vmatpush.bf16.msra.mxu1 %v1095_v29  ;;  %v1153_v29 = vld [vmem:[%s1313_s3 + $0x10] sm:$0xff] }
  0x24   :  { %615 = vmatpush.bf16.msra.mxu2 %v1103_v30 }
  0x25   :  { %629 = vmatpush.bf16.msra.mxu3 %v1111_v31  ;;  %588 = vmatmul.bf16.vlgmr.msra.gmra.mxu0 %v60_v46 }
  0x26   :  { %636 = vmatpush.bf16.msrb.mxu0 %v1126_v32  ;;  %602 = vmatmul.bf16.vlgmr.msra.gmra.mxu1 %v61_v47  ;;  %v1152_v32 = vld [vmem:[%s1313_s3 + $0x8] sm:$0xff] }
  0x27   :  { %650 = vmatpush.bf16.msrb.mxu1 %v1134_v33  ;;  %616 = vmatmul.bf16.vlgmr.msra.gmra.mxu2 %v62_v44 }
  0x28   :  { %664 = vmatpush.bf16.msrb.mxu2 %v1142_v42  ;;  %630 = vmatmul.bf16.vlgmr.msra.gmra.mxu3 %v63_v45 }
  0x29   :  { %678 = vmatpush.bf16.msrb.mxu3 %v1150_v43 }
  0x2a   :  { %637 = vmatpush.bf16.msrb.mxu0 %v1125_v48 }
  0x2b   :  { %651 = vmatpush.bf16.msrb.mxu1 %v1133_v49 }
  0x2c   :  { %665 = vmatpush.bf16.msrb.mxu2 %v1141_v50 }
  0x2d   :  { %679 = vmatpush.bf16.msrb.mxu3 %v1149_v51 }
  0x2e   :  { %638 = vmatpush.bf16.msrb.mxu0 %v1124_v52 }
  0x2f   :  { %652 = vmatpush.bf16.msrb.mxu1 %v1132_v53 }
  0x30   :  { %666 = vmatpush.bf16.msrb.mxu2 %v1140_v54 }
  0x31   :  { %680 = vmatpush.bf16.msrb.mxu3 %v1148_v55 }
  0x32   :  { %639 = vmatpush.bf16.msrb.mxu0 %v1123_v56 }
  0x33   :  { %653 = vmatpush.bf16.msrb.mxu1 %v1131_v57  ;;  %v1162_v57 = vld [vmem:[%s1312_s2] ss:$0 sm:$0xff] }
  0x34   :  { %667 = vmatpush.bf16.msrb.mxu2 %v1139_v58 }
  0x35   :  { %681 = vmatpush.bf16.msrb.mxu3 %v1147_v59 }
  0x36   :  { %640 = vmatpush.bf16.msrb.mxu0 %v1122_v60 }
  0x37   :  { %654 = vmatpush.bf16.msrb.mxu1 %v1130_v61 }
  0x38   :  { %668 = vmatpush.bf16.msrb.mxu2 %v1138_v62 }
  0x39   :  { %682 = vmatpush.bf16.msrb.mxu3 %v1146_v63 }
  0x3a   :  { %641 = vmatpush.bf16.msrb.mxu0 %v1121_v0 }
  0x3b   :  { %655 = vmatpush.bf16.msrb.mxu1 %v1129_v1 }
  0x3c   :  { %669 = vmatpush.bf16.msrb.mxu2 %v1137_v2 }
  0x3d   :  { %683 = vmatpush.bf16.msrb.mxu3 %v1145_v3 }
  0x3e   :  { %642 = vmatpush.bf16.msrb.mxu0 %v1120_v4  ;;  %v1163_v4 = vld [vmem:[%s1314_s4] ss:$0 sm:$0xff] }
  0x3f   :  { %656 = vmatpush.bf16.msrb.mxu1 %v1128_v5 }
  0x40   :  { %670 = vmatpush.bf16.msrb.mxu2 %v1136_v6 }
  0x41   :  { %684 = vmatpush.bf16.msrb.mxu3 %v1144_v7 }
  0x42   :  { %643 = vmatpush.bf16.msrb.mxu0 %v1119_v8 }
  0x43   :  { %657 = vmatpush.bf16.msrb.mxu1 %v1127_v9 }
  0x44   :  { %671 = vmatpush.bf16.msrb.mxu2 %v1135_v10 }
  0x45   :  { %685 = vmatpush.bf16.msrb.mxu3 %v1143_v11  ;;  %644 = vmatmul.bf16.vlgmr.msrb.gmra.mxu0 %v64_v20 }
  0x46   :  { %658 = vmatmul.bf16.vlgmr.msrb.gmra.mxu1 %v65_v21  ;;  %778 = vmatpush.bf16.msra.mxu0 %v1158_v24 }
  0x47   :  { %672 = vmatmul.bf16.vlgmr.msrb.gmra.mxu2 %v66_v22 }
  0x48   :  { %686 = vmatmul.bf16.vlgmr.msrb.gmra.mxu3 %v67_v23 }
  0x4a   :  { %779 = vmatpush.bf16.msra.mxu0 %v1157_v25 }
  0x4e   :  { %780 = vmatpush.bf16.msra.mxu0 %v1156_v26 }
  0x52   :  { %781 = vmatpush.bf16.msra.mxu0 %v1155_v27 }
  0x56   :  { %782 = vmatpush.bf16.msra.mxu0 %v1154_v28 }
  0x5a   :  { %783 = vmatpush.bf16.msra.mxu0 %v1153_v29 }
  0x5e   :  { %784 = vmatpush.bf16.msra.mxu0 %v1152_v32 }
  0x62   :  { %785 = vmatpush.bf16.msra.mxu0 %v1151_v35 }
  0xa2   :  { %v589_v30 = vpop.f32.mrf.mxu0 }
  0xa3   :  { %v603_v31 = vpop.f32.mrf.mxu1 }
  0xa4   :  { %v604_v37 = vadd.f32 %v603_v31, %v589_v30 }
  0xaa   :  { %v617_v33 = vpop.f32.mrf.mxu2  ;;  %v591_v36 = vpop.f32.mrf.mxu0 }
  0xab   :  { %v631_v34 = vpop.f32.mrf.mxu3  ;;  %v605_v38 = vpop.f32.mrf.mxu1  ;;  %v618_v39 = vadd.f32 %v617_v33, %v604_v37 }
  0xac   :  { %v606_v42 = vadd.f32 %v605_v38, %v591_v36 }
  0xad   :  { %v632_v44 = vadd.f32 %v631_v34, %v618_v39 }
  0xb2   :  { %v619_v40 = vpop.f32.mrf.mxu2 }
  0xb3   :  { %v633_v41 = vpop.f32.mrf.mxu3  ;;  %v620_v46 = vadd.f32 %v619_v40, %v606_v42 }
  0xb5   :  { %v634_v50 = vadd.f32 %v633_v41, %v620_v46 }
  0xc2   :  { %v645_v43 = vpop.f32.mrf.mxu0 }
  0xc3   :  { %v659_v45 = vpop.f32.mrf.mxu1  ;;  %v646_v47 = vadd.f32 %v645_v43, %v632_v44 }
  0xc5   :  { %v660_v51 = vadd.f32 %v659_v45, %v646_v47 }
  0xca   :  { %v673_v48 = vpop.f32.mrf.mxu2  ;;  %v647_v52 = vpop.f32.mrf.mxu0 }
  0xcb   :  { %v687_v49 = vpop.f32.mrf.mxu3  ;;  %v674_v53 = vadd.f32 %v673_v48, %v660_v51  ;;  %v648_v54 = vadd.f32 %v647_v52, %v634_v50  ;;  %v661_v55 = vpop.f32.mrf.mxu1 }
  0xcd   :  { %v688_v56 = vadd.f32 %v687_v49, %v674_v53  ;;  %v662_v58 = vadd.f32 %v661_v55, %v648_v54 }
  0xcf   :  { %v705_v62 = vadd.f32 %v1162_v57, %v688_v56 }
  0xd1   :  { %v707_v1 = vmax.f32 %v705_v62, 0.0 }
  0xd2   :  { %v675_v59 = vpop.f32.mrf.mxu2 }
  0xd3   :  { %v676_v60 = vadd.f32 %v675_v59, %v662_v58  ;;  %v689_v61 = vpop.f32.mrf.mxu3 }
  0xd5   :  { %v690_v63 = vadd.f32 %v689_v61, %v676_v60 }
  0xd7   :  { %v706_v0 = vadd.f32 %v1162_v57, %v690_v63 }
  0xd9   :  { %v708_v2 = vmax.f32 %v706_v0, 0.0 }
  0xdb   :  { %v709_v3 = vpack.c.bf16 %v708_v2, %v707_v1 }
  0xdd   :  { %786 = vmatmul.bf16.vlgmr.msra.gmra.mxu0 %v709_v3 }
 0x15a   :  { %v787_v5 = vpop.f32.mrf.mxu0 }
 0x15b   :  { %v788_v6 = vadd.f32 %v1163_v4, %v787_v5 }
 0x15d   :  { %792 = vst [vmem:[%s1315_s5] sm:$0xff] %v788_v6 }
 0x162   :  { %v789_v7 = vpop.f32.mrf.mxu0 }
 0x163   :  { %v790_v8 = vadd.f32 %v1163_v4, %v789_v7 }
 0x165   :  { %793 = vst [vmem:[%s1315_s5 + $0x8] sm:$0xff] %v790_v8 }
 0x166   :  { %798 = vsyncpa [#allocation4], 1 }

</bundles_post_ra>
